<compile_context>
chip_gen: v7x
topology: tpu7x:2x2x1
jax: 0.10.0
libtpu: 0.0.40
codegen_flags: <defaults>
</compile_context>

<pallas_src>
import functools
import math

import jax
import jax.numpy as jnp
from jax import lax
from jax.experimental import pallas as pl
from jax.experimental.pallas import tpu as pltpu

F32 = jnp.float32
BF16 = jnp.bfloat16


def _round_up(x, m):
    return ((x + m - 1) // m) * m


# ---------------------------------------------------------------------------
# Kernel 1: K / V projections — computed once per key row (not once per q tile)
# ---------------------------------------------------------------------------
def kv_projection_kernel(k_in_ref, v_in_ref, wk_ref, bk_ref, wv_ref, bv_ref,
                         k_out_ref, v_out_ref):
    keys = k_in_ref[...].astype(BF16)
    values = v_in_ref[...].astype(BF16)
    k = jnp.dot(keys, wk_ref[...], preferred_element_type=F32) + bk_ref[...]
    v = jnp.dot(values, wv_ref[...], preferred_element_type=F32) + bv_ref[...]
    k_out_ref[...] = k.astype(BF16)
    v_out_ref[...] = v.astype(BF16)


# ---------------------------------------------------------------------------
# Kernel 2: adaptive attention, streamed over key tiles
# ---------------------------------------------------------------------------
def adaptive_attention_kernel(q_in_ref, lang_ref, k_ref, v_ref,
                              wq_ref, bq_ref, ws_ref, bs_ref, wo_ref, bo_ref,
                              out_ref,
                              q_bf, s_f32, lang_sc, m_sc, d_sc, acc, out_bf,
                              *, d_k, d_v, h, block_k, nk, mask_keys):
    j = pl.program_id(2)
    n_kt = pl.num_programs(2)
    scale = 1.0 / math.sqrt(d_k)

    # ---- per-q-tile init: q/s projections + online-softmax state -----------
    @pl.when(j == 0)
    def _init():
        queries = q_in_ref[...].astype(BF16)
        lang = lang_ref[...].astype(BF16)
        # fold 1/sqrt(d_k) into q once (f32), instead of scaling every score tile
        q = (jnp.dot(queries, wq_ref[...], preferred_element_type=F32)
             + bq_ref[...]) * scale
        s = jnp.dot(lang, ws_ref[...], preferred_element_type=F32) + bs_ref[...]
        s_f32[...] = s                       # f32 copy needed for the gating math
        q_bf[...] = q.astype(BF16)           # only the bf16 copy of q stays live
        # language logit per head: <q, s> / sqrt(d_k)  (scale already inside q)
        for hd in range(h):
            sl = slice(hd * d_k, (hd + 1) * d_k)
            lang_col = jnp.sum(q[:, sl] * s[:, sl], axis=-1, keepdims=True)
            lang_sc[:, hd:hd + 1] = lang_col
            m_sc[:, hd:hd + 1] = lang_col    # running max initialized with lang logit
        d_sc[...] = jnp.ones_like(d_sc)      # exp(lang - m) == 1
        acc[...] = jnp.zeros_like(acc)

    # ---- one key tile: raw scores, online denominator, att @ v accumulation
    if mask_keys:
        kv_idx = j * block_k + lax.broadcasted_iota(jnp.int32, (1, block_k), 1)
        valid = kv_idx < nk
    for hd in range(h):
        qsl = slice(hd * d_k, (hd + 1) * d_k)
        vsl = slice(hd * d_v, (hd + 1) * d_v)
        qh = q_bf[:, qsl]                    # (bq, d_k)  bf16, pre-scaled
        kh = k_ref[:, qsl]                   # (bk, d_k)  bf16, already projected
        vh = v_ref[:, vsl]                   # (bk, d_v)  bf16, already projected
        # K^T folded into the contraction; f32 accumulation on the MXU
        att = lax.dot_general(qh, kh, (((1,), (1,)), ((), ())),
                              preferred_element_type=F32)        # (bq, bk) raw scaled
        if mask_keys:
            att = jnp.where(valid, att, -1e30)
            att_v_lhs = jnp.where(valid, att, 0.0)
        else:
            att_v_lhs = att
        m_old = m_sc[:, hd:hd + 1]
        m_new = jnp.maximum(m_old, jnp.max(att, axis=-1, keepdims=True))
        alpha = jnp.exp(m_old - m_new)
        d_sc[:, hd:hd + 1] = (d_sc[:, hd:hd + 1] * alpha
                              + jnp.sum(jnp.exp(att - m_new), axis=-1, keepdims=True))
        m_sc[:, hd:hd + 1] = m_new
        # exactly as in the PyTorch module: att @ v uses the UN-normalized scores,
        # which is linear in the scores -> a plain running sum is exact (no rescale).
        acc[:, vsl] += jnp.dot(att_v_lhs.astype(BF16), vh,
                               preferred_element_type=F32)

    # ---- finalize: beta gating + fused fc_o ---------------------------------
    @pl.when(j == n_kt - 1)
    def _finalize():
        for hd in range(h):
            qsl = slice(hd * d_k, (hd + 1) * d_k)
            vsl = slice(hd * d_v, (hd + 1) * d_v)
            beta = (jnp.exp(lang_sc[:, hd:hd + 1] - m_sc[:, hd:hd + 1])
                    * pl.reciprocal(d_sc[:, hd:hd + 1], approx=True))     # (bq, 1)
            gated = beta * s_f32[:, qsl] + (1.0 - beta) * acc[:, vsl]
            out_bf[:, vsl] = gated.astype(BF16)     # 128-aligned lane offset, no concat
        out_ref[...] = (jnp.dot(out_bf[...], wo_ref[...], preferred_element_type=F32)
                        + bo_ref[...]).astype(out_ref.dtype)


# ---------------------------------------------------------------------------
# Wrapper
# ---------------------------------------------------------------------------
def _default_tiling():
    vmem_bytes = None
    try:
        vmem_bytes = getattr(pltpu.get_tpu_info(), "vmem_capacity_bytes", None)
    except Exception:
        pass
    if vmem_bytes is None:
        vmem_bytes = 64 * 1024 * 1024                 # conservative (v7x-sized)
    if vmem_bytes >= 100 * 1024 * 1024:               # v5e / v6e: 128 MiB physical
        return 512, 512, 64 * 1024 * 1024
    return 256, 512, 48 * 1024 * 1024                 # v7x: 64 MiB physical


def adaptive_attention(queries, keys, values, language_feature, params,
                       *, d_k, d_v, h, block_q=None, block_k=None,
                       out_dtype=jnp.float32):
    # The module's `beta * s + (1 - beta) * att_v` broadcast requires d_k == d_v.
    assert d_k == d_v, "d_k must equal d_v (as required by the PyTorch forward)"
    b_s, nq, d_model = queries.shape
    nk = keys.shape[1]
    wq, bq, wk, bk, wv, bv, ws, bs, wo, bo = params
    # Weights in bf16 (native MXU dtype, halves VMEM); biases stay f32.
    wq, wk, wv, ws, wo = (w.astype(BF16) for w in (wq, wk, wv, ws, wo))

    dflt_q, dflt_k, vmem_limit = _default_tiling()
    block_q = dflt_q if block_q is None else _round_up(block_q, 8)
    block_k = dflt_k if block_k is None else _round_up(block_k, 8)
    block_q = min(block_q, _round_up(nq, 8))
    block_k = min(block_k, _round_up(nk, 8))
    nq_pad = _round_up(nq, block_q)
    nk_pad = _round_up(nk, block_k)

    if nq_pad != nq:
        pad = ((0, 0), (0, nq_pad - nq), (0, 0))
        queries = jnp.pad(queries, pad)
        language_feature = jnp.pad(language_feature, pad)
    if nk_pad != nk:
        pad = ((0, 0), (0, nk_pad - nk), (0, 0))
        keys = jnp.pad(keys, pad)
        values = jnp.pad(values, pad)

    # ---- kernel 1: project K / V once per key row ---------------------------
    def full_spec2(arr):
        nd = arr.ndim
        return pl.BlockSpec(arr.shape, lambda b, j, _nd=nd: (0,) * _nd)

    k_proj, v_proj = pl.pallas_call(
        kv_projection_kernel,
        out_shape=(jax.ShapeDtypeStruct((b_s, nk_pad, h * d_k), BF16),
                   jax.ShapeDtypeStruct((b_s, nk_pad, h * d_v), BF16)),
        grid=(b_s, nk_pad // block_k),
        in_specs=[pl.BlockSpec((None, block_k, d_model), lambda b, j: (b, j, 0)),
                  pl.BlockSpec((None, block_k, d_model), lambda b, j: (b, j, 0)),
                  full_spec2(wk), full_spec2(bk), full_spec2(wv), full_spec2(bv)],
        out_specs=(pl.BlockSpec((None, block_k, h * d_k), lambda b, j: (b, j, 0)),
                   pl.BlockSpec((None, block_k, h * d_v), lambda b, j: (b, j, 0))),
        compiler_params=pltpu.CompilerParams(
            dimension_semantics=("parallel", "parallel"),
            vmem_limit_bytes=vmem_limit),
    )(keys, values, wk, bk, wv, bv)

    # ---- kernel 2: streamed attention + adaptive gating + fc_o --------------
    kernel = functools.partial(
        adaptive_attention_kernel, d_k=d_k, d_v=d_v, h=h,
        block_k=block_k, nk=nk, mask_keys=(nk_pad != nk))

    def full_spec3(arr):
        nd = arr.ndim
        return pl.BlockSpec(arr.shape, lambda b, i, j, _nd=nd: (0,) * _nd)

    grid = (b_s, nq_pad // block_q, nk_pad // block_k)

    out = pl.pallas_call(
        kernel,
        out_shape=jax.ShapeDtypeStruct((b_s, nq_pad, d_model), out_dtype),
        grid=grid,
        in_specs=[pl.BlockSpec((None, block_q, d_model), lambda b, i, j: (b, i, 0)),
                  pl.BlockSpec((None, block_q, d_model), lambda b, i, j: (b, i, 0)),
                  pl.BlockSpec((None, block_k, h * d_k), lambda b, i, j: (b, j, 0)),
                  pl.BlockSpec((None, block_k, h * d_v), lambda b, i, j: (b, j, 0)),
                  full_spec3(wq), full_spec3(bq), full_spec3(ws), full_spec3(bs),
                  full_spec3(wo), full_spec3(bo)],
        out_specs=pl.BlockSpec((None, block_q, d_model), lambda b, i, j: (b, i, 0)),
        scratch_shapes=[pltpu.VMEM((block_q, h * d_k), BF16),   # scaled q projection
                        pltpu.VMEM((block_q, h * d_k), F32),    # s projection (gating)
                        pltpu.VMEM((block_q, h), F32),          # language logits
                        pltpu.VMEM((block_q, h), F32),          # running max
                        pltpu.VMEM((block_q, h), F32),          # running denominator
                        pltpu.VMEM((block_q, h * d_v), F32),    # att @ v accumulator
                        pltpu.VMEM((block_q, h * d_v), BF16)],  # gated heads for fc_o
        compiler_params=pltpu.CompilerParams(
            dimension_semantics=("parallel", "parallel", "arbitrary"),
            vmem_limit_bytes=vmem_limit),
    )(queries, language_feature, k_proj, v_proj,
      wq, bq, ws, bs, wo, bo)

    return out[:, :nq, :] if nq_pad != nq else out


# ---------------------------------------------------------------------------
# Deterministic synthetic parameter init (xavier_uniform weights, zero biases,
# matching the module's init_weights). Weights stored pre-transposed (in, out).
# ---------------------------------------------------------------------------
def xavier_uniform(key, fan_in, fan_out):
    bound = math.sqrt(6.0 / (fan_in + fan_out))
    return jax.random.uniform(key, (fan_in, fan_out), jnp.float32, -bound, bound)


def init_params(key, d_model, d_k, d_v, h):
    ks = jax.random.split(key, 5)
    wq = xavier_uniform(ks[0], d_model, h * d_k)
    wk = xavier_uniform(ks[1], d_model, h * d_k)
    wv = xavier_uniform(ks[2], d_model, h * d_v)
    ws = xavier_uniform(ks[3], d_model, h * d_k)
    wo = xavier_uniform(ks[4], h * d_v, d_model)
    bq = jnp.zeros((1, h * d_k), jnp.float32)
    bk = jnp.zeros((1, h * d_k), jnp.float32)
    bv = jnp.zeros((1, h * d_v), jnp.float32)
    bs = jnp.zeros((1, h * d_k), jnp.float32)
    bo = jnp.zeros((1, d_model), jnp.float32)
    return (wq, bq, wk, bk, wv, bv, ws, bs, wo, bo)


def reference(queries, keys, values, lang, params, d_k, d_v, h):
    """Pure-JAX f32 mirror of the PyTorch forward (mask/weights = None)."""
    wq, bq, wk, bk, wv, bv, ws, bs, wo, bo = params
    b_s, nq, d_model = queries.shape
    nk = keys.shape[1]
    q = (queries @ wq + bq).reshape(b_s, nq, h, d_k).transpose(0, 2, 1, 3)   # (b,h,nq,dk)
    s = (lang @ ws + bs).reshape(b_s, nq, h, d_k).transpose(0, 2, 1, 3)      # (b,h,nq,dk)
    k = (keys @ wk + bk).reshape(b_s, nk, h, d_k).transpose(0, 2, 3, 1)      # (b,h,dk,nk)
    v = (values @ wv + bv).reshape(b_s, nk, h, d_v).transpose(0, 2, 1, 3)    # (b,h,nk,dv)
    att = jnp.matmul(q, k) / jnp.sqrt(jnp.float32(d_k))                      # (b,h,nq,nk)
    lang_att = jnp.sum(q * s, axis=-1, keepdims=True) / jnp.sqrt(jnp.float32(d_k))
    combined = jax.nn.softmax(jnp.concatenate([att, lang_att], -1), -1)
    att_v = jnp.matmul(att, v)                       # raw scores, as in the PyTorch code
    beta = combined[..., -1:]
    out = beta * s + (1.0 - beta) * att_v
    out = out.transpose(0, 2, 1, 3).reshape(b_s, nq, h * d_v)
    return out @ wo + bo


if __name__ == "__main__":
    # Lane-friendly config: d_model = 128, per-head width 128 (128-aligned slices).
    d_model, d_k, d_v, h = 128, 128, 128, 4
    # nk is NOT a multiple of the key tile -> exercises padding + in-kernel masking.
    b_s, nq, nk = 2, 16, 12

    key = jax.random.PRNGKey(0)
    kq, kk, kv, kl, kp = jax.random.split(key, 5)
    queries = jax.random.normal(kq, (b_s, nq, d_model), jnp.float32)
    keys = jax.random.normal(kk, (b_s, nk, d_model), jnp.float32)
    values = jax.random.normal(kv, (b_s, nk, d_model), jnp.float32)
    language_feature = jax.random.normal(kl, (b_s, nq, d_model), jnp.float32)
    params = init_params(kp, d_model, d_k, d_v, h)

    # Small explicit tiles so this test covers multiple q tiles, multiple key tiles
    # (online accumulation) and the masked final key tile; production callers leave
    # block_q / block_k = None to get the generation-tuned defaults.
    out = adaptive_attention(queries, keys, values, language_feature, params,
                             d_k=d_k, d_v=d_v, h=h, block_q=8, block_k=8)
    out = jax.block_until_ready(out)

    ref = reference(queries, keys, values, language_feature, params, d_k, d_v, h)
    assert out.shape == (b_s, nq, d_model)
    # Tolerance for the bf16 MXU path + approximate reciprocal.
    rel_err = float(jnp.max(jnp.abs(out - ref)) / (jnp.max(jnp.abs(ref)) + 1e-6))
    assert rel_err < 5e-2, f"mismatch vs JAX reference: rel-max err {rel_err}"
    print("KERNEL_OK")
</pallas_src>

<mosaic_0001>
module attributes {stable_mosaic.version = 11 : i64} {
  func.func @kv_projection_kernel(%arg0: i32, %arg1: i32, %arg2: memref<1x8x128xf32, #tpu.memory_space<vmem>>, %arg3: memref<1x8x128xf32, #tpu.memory_space<vmem>>, %arg4: memref<128x512xbf16, #tpu.memory_space<vmem>>, %arg5: memref<1x512xf32, #tpu.memory_space<vmem>>, %arg6: memref<128x512xbf16, #tpu.memory_space<vmem>>, %arg7: memref<1x512xf32, #tpu.memory_space<vmem>>, %arg8: memref<1x8x512xbf16, #tpu.memory_space<vmem>>, %arg9: memref<1x8x512xbf16, #tpu.memory_space<vmem>>) attributes {dimension_semantics = [#tpu.dimension_semantics<parallel>, #tpu.dimension_semantics<parallel>], iteration_bounds = array<i64: 2, 2>, scalar_prefetch = 0 : i64, scratch_operands = 0 : i64, tpu.core_type = #tpu.core_type<tc>, window_params = [{transform_indices = @transform_0, window_bounds = array<i64: 1, 8, 128>}, {transform_indices = @transform_1, window_bounds = array<i64: 1, 8, 128>}, {pipeline_mode = #tpu.pipeline_mode<synchronous>, transform_indices = @transform_2, window_bounds = array<i64: 128, 512>}, {pipeline_mode = #tpu.pipeline_mode<synchronous>, transform_indices = @transform_3, window_bounds = array<i64: 1, 512>}, {pipeline_mode = #tpu.pipeline_mode<synchronous>, transform_indices = @transform_4, window_bounds = array<i64: 128, 512>}, {pipeline_mode = #tpu.pipeline_mode<synchronous>, transform_indices = @transform_5, window_bounds = array<i64: 1, 512>}, {transform_indices = @transform_6, window_bounds = array<i64: 1, 8, 512>}, {transform_indices = @transform_7, window_bounds = array<i64: 1, 8, 512>}]} {
    %c0 = arith.constant 0 : index
    %c0_0 = arith.constant 0 : index
    %c0_1 = arith.constant 0 : index
    %0 = vector.load %arg2[%c0, %c0_0, %c0_1] : memref<1x8x128xf32, #tpu.memory_space<vmem>>, vector<1x8x128xf32>
    %1 = vector.shape_cast %0 : vector<1x8x128xf32> to vector<8x128xf32>
    %2 = arith.truncf %1 : vector<8x128xf32> to vector<8x128xbf16>
    %c0_2 = arith.constant 0 : index
    %c0_3 = arith.constant 0 : index
    %c0_4 = arith.constant 0 : index
    %3 = vector.load %arg3[%c0_2, %c0_3, %c0_4] : memref<1x8x128xf32, #tpu.memory_space<vmem>>, vector<1x8x128xf32>
    %4 = vector.shape_cast %3 : vector<1x8x128xf32> to vector<8x128xf32>
    %5 = arith.truncf %4 : vector<8x128xf32> to vector<8x128xbf16>
    %c0_5 = arith.constant 0 : index
    %c0_6 = arith.constant 0 : index
    %6 = vector.load %arg4[%c0_5, %c0_6] : memref<128x512xbf16, #tpu.memory_space<vmem>>, vector<128x512xbf16>
    %cst = arith.constant dense<0.000000e+00> : vector<8x512xf32>
    %7 = tpu.matmul %2, %6, %cst {dimension_numbers = #tpu.dot_dimension_numbers<[1], [0], [0], [1], [0, 0, 1, 1], [], []>} : vector<8x128xbf16>, vector<128x512xbf16>, vector<8x512xf32> -> vector<8x512xf32>
    %c0_7 = arith.constant 0 : index
    %c0_8 = arith.constant 0 : index
    %8 = vector.load %arg5[%c0_7, %c0_8] : memref<1x512xf32, #tpu.memory_space<vmem>>, vector<1x512xf32>
    %9 = vector.broadcast %8 : vector<1x512xf32> to vector<8x512xf32>
    %10 = arith.addf %7, %9 : vector<8x512xf32>
    %c0_9 = arith.constant 0 : index
    %c0_10 = arith.constant 0 : index
    %11 = vector.load %arg6[%c0_9, %c0_10] : memref<128x512xbf16, #tpu.memory_space<vmem>>, vector<128x512xbf16>
    %cst_11 = arith.constant dense<0.000000e+00> : vector<8x512xf32>
    %12 = tpu.matmul %5, %11, %cst_11 {dimension_numbers = #tpu.dot_dimension_numbers<[1], [0], [0], [1], [0, 0, 1, 1], [], []>} : vector<8x128xbf16>, vector<128x512xbf16>, vector<8x512xf32> -> vector<8x512xf32>
    %c0_12 = arith.constant 0 : index
    %c0_13 = arith.constant 0 : index
    %13 = vector.load %arg7[%c0_12, %c0_13] : memref<1x512xf32, #tpu.memory_space<vmem>>, vector<1x512xf32>
    %14 = vector.broadcast %13 : vector<1x512xf32> to vector<8x512xf32>
    %15 = arith.addf %12, %14 : vector<8x512xf32>
    %16 = arith.truncf %10 : vector<8x512xf32> to vector<8x512xbf16>
    %c0_14 = arith.constant 0 : index
    %c0_15 = arith.constant 0 : index
    %c0_16 = arith.constant 0 : index
    %17 = vector.load %arg8[%c0_14, %c0_15, %c0_16] : memref<1x8x512xbf16, #tpu.memory_space<vmem>>, vector<1x8x512xbf16>
    %18 = vector.shape_cast %17 : vector<1x8x512xbf16> to vector<8x512xbf16>
    %19 = vector.shape_cast %16 : vector<8x512xbf16> to vector<1x8x512xbf16>
    tpu.vector_store %arg8[%c0_14, %c0_15, %c0_16], %19 {strides = array<i32>} : memref<1x8x512xbf16, #tpu.memory_space<vmem>>, vector<1x8x512xbf16>,
    %20 = arith.truncf %15 : vector<8x512xf32> to vector<8x512xbf16>
    %c0_17 = arith.constant 0 : index
    %c0_18 = arith.constant 0 : index
    %c0_19 = arith.constant 0 : index
    %21 = vector.load %arg9[%c0_17, %c0_18, %c0_19] : memref<1x8x512xbf16, #tpu.memory_space<vmem>>, vector<1x8x512xbf16>
    %22 = vector.shape_cast %21 : vector<1x8x512xbf16> to vector<8x512xbf16>
    %23 = vector.shape_cast %20 : vector<8x512xbf16> to vector<1x8x512xbf16>
    tpu.vector_store %arg9[%c0_17, %c0_18, %c0_19], %23 {strides = array<i32>} : memref<1x8x512xbf16, #tpu.memory_space<vmem>>, vector<1x8x512xbf16>,
    return
  }
  func.func @transform_0(%arg0: i32, %arg1: i32) -> (i32, i32, i32) {
    %c0_i32 = arith.constant 0 : i32
    %c0_i32_0 = arith.constant 0 : i32
    return %arg0, %arg1, %c0_i32 : i32, i32, i32
  }
  func.func @transform_1(%arg0: i32, %arg1: i32) -> (i32, i32, i32) {
    %c0_i32 = arith.constant 0 : i32
    %c0_i32_0 = arith.constant 0 : i32
    return %arg0, %arg1, %c0_i32 : i32, i32, i32
  }
  func.func @transform_2(%arg0: i32, %arg1: i32) -> (i32, i32) {
    %c0_i32 = arith.constant 0 : i32
    %c0_i32_0 = arith.constant 0 : i32
    %c0_i32_1 = arith.constant 0 : i32
    return %c0_i32, %c0_i32_0 : i32, i32
  }
  func.func @transform_3(%arg0: i32, %arg1: i32) -> (i32, i32) {
    %c0_i32 = arith.constant 0 : i32
    %c0_i32_0 = arith.constant 0 : i32
    %c0_i32_1 = arith.constant 0 : i32
    return %c0_i32, %c0_i32_0 : i32, i32
  }
  func.func @transform_4(%arg0: i32, %arg1: i32) -> (i32, i32) {
    %c0_i32 = arith.constant 0 : i32
    %c0_i32_0 = arith.constant 0 : i32
    %c0_i32_1 = arith.constant 0 : i32
    return %c0_i32, %c0_i32_0 : i32, i32
  }
  func.func @transform_5(%arg0: i32, %arg1: i32) -> (i32, i32) {
    %c0_i32 = arith.constant 0 : i32
    %c0_i32_0 = arith.constant 0 : i32
    %c0_i32_1 = arith.constant 0 : i32
    return %c0_i32, %c0_i32_0 : i32, i32
  }
  func.func @transform_6(%arg0: i32, %arg1: i32) -> (i32, i32, i32) {
    %c0_i32 = arith.constant 0 : i32
    %c0_i32_0 = arith.constant 0 : i32
    return %arg0, %arg1, %c0_i32 : i32, i32, i32
  }
  func.func @transform_7(%arg0: i32, %arg1: i32) -> (i32, i32, i32) {
    %c0_i32 = arith.constant 0 : i32
    %c0_i32_0 = arith.constant 0 : i32
    return %arg0, %arg1, %c0_i32 : i32, i32, i32
  }
}

</mosaic_0001>

<bundles_post_ra>
// kernel: tpu_custom_call.1
= control target key start
LH: loop header
LB: loop body
LE: loop exit
PB: predicated region body
PF: predicated region fallthrough
CT: control target
= control target key end

     0   :  { %s2219_s0 = inlined_call_operand.hbm [shape: f32[2,16,128], index: 0, kind: input, shape index: {}]   ;;  %s2220_s1 = inlined_call_operand.hbm [shape: f32[2,16,128], index: 1, kind: input, shape index: {}]   ;;  %s2221_s2 = inlined_call_operand.hbm [shape: bf16[128,512], index: 2, kind: input, shape index: {}]   ;;  %s2222_s3 = inlined_call_operand.vmem [shape: f32[1,512], index: 3, kind: input, shape index: {}]   ;;  %s2223_s4 = inlined_call_operand.hbm [shape: bf16[128,512], index: 4, kind: input, shape index: {}]   ;;  %s2224_s5 = inlined_call_operand.vmem [shape: f32[1,512], index: 5, kind: input, shape index: {}]   ;;  %s2225_s6 = inlined_call_operand.hbm [shape: bf16[2,16,512], index: 6, kind: output, shape index: {0}]   ;;  %s2226_s7 = inlined_call_operand.hbm [shape: bf16[2,16,512], index: 7, kind: output, shape index: {1}]  }
   0x1   :  { %2237 = sst [smem:[#allocation23_spill]] %s2221_s2 }
   0x2   :  { %2238 = sst [smem:[#allocation24_spill]] %s2223_s4 }
   0x3   :  { %2239 = sst [smem:[#allocation25_spill]] %s2224_s5 }
   0x4   :  { %2240 = sst [smem:[#allocation26_spill]] %s2225_s6 }
   0x5   :  { %2241 = sst [smem:[#allocation27_spill]] %s2226_s7 }
   0x6   :  { %13 = vsyncpa [#allocation3], 0 }
   0x7   :  { %15 = vsyncpa [#allocation3 + $0x1], 0 }
   0x8   :  { %16 = vsyncpa [#allocation6], 0 }
   0x9   :  { %18 = vsyncpa [#allocation6 + $0x1], 0 }
   0xa   :  { %19 = vsyncpa [#allocation9], 0 }
   0xb   :  { %20 = vsyncpa [#allocation4], 0 }
   0xc   :  { %22 = vsyncpa [#allocation4 + $0x1], 0 }
   0xd   :  { %23 = vsyncpa [#allocation12], 0 }
   0xe   :  { %25 = vsyncpa [#allocation12 + $0x1], 0  ;;  %s1849_s24 = smov 0   ;;  %s1851_s25 = smov 0  }
   0xf   :  { %s1853_s26 = smov 0   ;;  %s1855_s27 = smov 0  }
  0x10   :  { %s1857_s28 = smov 0   ;;  %s1859_s29 = smov 0  }
  0x11   :  { %s1861_s30 = smov 0   ;;  %s1863_s8 = smov 0  }
  0x12 LB: > { %2242 = sst [smem:[#allocation19_spill]] %s1770_s24  ;;  %s1890_s9 = sadd.s32 4294967295, %s1798_s8   ;;  %s1798_s8 = sphi %s1863_s8, %s31_s8   ;;  %s1794_s30 = sphi %s1861_s30, %s2277_s30   ;;  %s1790_s29 = sphi %s1859_s29, %s2276_s29   ;;  %s1786_s28 = sphi %s1857_s28, %s2275_s28   ;;  %s1782_s27 = sphi %s1855_s27, %s2274_s27   ;;  %s1778_s26 = sphi %s1853_s26, %s2273_s26   ;;  %s1774_s25 = sphi %s1851_s25, %s2272_s25   ;;  %s1770_s24 = sphi %s1849_s24, %s2271_s24  }
  0x13   : > { %s1232_s10 = sadd.s32 4294967294, %s1798_s8   ;;  %p65_p0 = scmp.ne.s32.totalorder %s1774_s25, %s1770_s24 }
  0x14   : > { %p2227_p1 = scmp.eq.s32.totalorder %s1890_s9, 0  ;;  %p209_p3 = scmp.eq.s32.totalorder %s1232_s10, 3 }
  0x15   : > { %p1233_p5 = scmp.ge.s32.totalorder %s1798_s8, 1  ;;  %p244_p7 = scmp.lt.s32.totalorder %s1798_s8, 5 }
  0x16   : > { %p1899_p4 = por %p2227_p1, %p65_p0  ;;  %p1904_p6 = por %p209_p3, %p65_p0 }
  0x17   : > { %p1909_p8 = pnand %p1233_p5, %p244_p7  ;;  %s1800_s14 = smov [#allocation7]  }
  0x18   : > { %s2243_s11 = scalar_select %p1899_p4, 1, 0 }
  0x19   : > { %s2244_s12 = scalar_select %p1904_p6, 1, 0 }
  0x1a   : > { %s2246_s13 = scalar_select %p1909_p8, 1, 0 }
  0x1b   : > { %2245 = sst [smem:[#allocation20_spill]] %s2244_s12  ;;  %s256_s15 = sshll.u32 %s1800_s14, 4  ;;  %s257_s15 = int_to_ptr.vmem [resolvable:$true] %s256_s15 }
  0x1c   : > { %p1348_p9 = pneg %p1909_p8  ;;  %s1801_s17 = smov [#allocation8]  }
  0x1d   : > { %s272_s18 = sshll.u32 %s1801_s17, 4  ;;  %s2248_s2 = sld [smem:[#allocation23_spill]]  ;;  %s1921_s18 = int_to_ptr.vmem [resolvable:$true] %s272_s18 }
  0x1e   : > { %p1917_p10 = pnand %p1348_p9, %p2227_p1 }
  0x20   : > { %p1542_p12 = pneg %p1917_p10 }
  0x23   : > { %s1540_s21 = scalar_lea.hbm %s2248_s2, 4096 }
  0x24   : > { %p1541_p11 = scmp.ne.s32.totalorder %s2248_s2, %s1540_s21  ;;  %p1547_p3 = scmp.lt.u32.totalorder %s1540_s21, %s2248_s2 }
  0x26   : > { %p1543_p13 = pnand %p1542_p12, %p1541_p11 }
  0x28   : > { %p1544_p0 = pneg %p1543_p13 }
  0x2a   : > { %p1549_p5 = pnand %p1547_p3, %p1544_p0 }
  0x2c   : > { %1552 = shalt.err (!%p1549_p5)
}
  0x2d   : > { %s1553_s17 = scalar_lea.vmem %s257_s15, 4096  ;;  %p1561_p2 = scmp.lt.s32.totalorder %s257_s15, %s257_s15 }
  0x2e   : > { %p1554_p7 = scmp.ne.s32.totalorder %s257_s15, %s1553_s17  ;;  %p1562_p6 = scmp.lt.s32.totalorder %s1553_s17, %s1553_s17 }
  0x30   : > { %p1556_p9 = pnand %p1554_p7, %p1542_p12  ;;  %p1563_p4 = por %p1562_p6, %p1561_p2 }
  0x32   : > { %p1557_p1 = pneg %p1556_p9 }
  0x34   : > { %p1564_p8 = pnand %p1563_p4, %p1557_p1 }
  0x36   : > { %1567 = shalt.err (!%p1564_p8)
}
  0x37   : > { %s1802_s19 = smov 256   ;;  %s1803_s20 = smov 16  }
  0x38   : > { %1351 = dma.hbm_to_vmem [thread:$0]  (!%p1917_p10), %s2248_s2, 4096, %s257_s15, [#allocation6], %s1802_s19, %s1802_s19, %s1803_s20  }
  0x39   : > { %s2249_s4 = sld [smem:[#allocation24_spill]] }
  0x3f   : > { %s1568_s14 = scalar_lea.hbm %s2249_s4, 4096 }
  0x40   : > { %p1569_p11 = scmp.ne.s32.totalorder %s2249_s4, %s1568_s14  ;;  %p1575_p4 = scmp.lt.u32.totalorder %s1568_s14, %s2249_s4 }
  0x42   : > { %p1571_p1 = pnand %p1569_p11, %p1542_p12 }
  0x44   : > { %p1572_p2 = pneg %p1571_p1 }
  0x46   : > { %p1577_p6 = pnand %p1575_p4, %p1572_p2 }
  0x48   : > { %1580 = shalt.err (!%p1577_p6)
}
  0x49   : > { %s1581_s15 = scalar_lea.vmem %s1921_s18, 4096  ;;  %p1589_p3 = scmp.lt.s32.totalorder %s1921_s18, %s1921_s18 }
  0x4a   : > { %p1582_p8 = scmp.ne.s32.totalorder %s1921_s18, %s1581_s15  ;;  %p1590_p5 = scmp.lt.s32.totalorder %s1581_s15, %s1581_s15 }
  0x4c   : > { %p1584_p13 = pnand %p1582_p8, %p1542_p12  ;;  %p1591_p7 = por %p1590_p5, %p1589_p3 }
  0x4e   : > { %p1585_p0 = pneg %p1584_p13 }
  0x50   : > { %p1592_p9 = pnand %p1591_p7, %p1585_p0 }
  0x52   : > { %1595 = shalt.err (!%p1592_p9)
}
  0x53   : > { %1354 = dma.hbm_to_vmem [thread:$0]  (!%p1917_p10), %s2249_s4, 4096, %s1921_s18, [#allocation9], %s1802_s19, %s1802_s19, %s1803_s20  }
  0x54   : > { %s40_s12 = sadd.s32 1, %s1790_s29  ;;  %s43_s21 = sadd.s32 1, %s1794_s30 }
  0x55   : > { %p41_p12 = scmp.ge.s32.totalorder %s40_s12, 2  ;;  %s52_s16 = sadd.s32 1, %s1778_s26 }
  0x56   : > { %p59_p11 = scmp.ne.s32.totalorder %s1778_s26, %s1774_s25  ;;  %p60_p1 = scmp.eq.s32.totalorder %s1798_s8, 0 }
  0x57   : > { %s2279_s12 = smov (%p41_p12, %s40_s12), 0  ;;  %s2281_s21 = smov (!%p41_p12, %s43_s21), %s1794_s30 }
  0x58   : > { %2250 = sst [smem:[#allocation21_spill]] %s2279_s12  ;;  %s48_s22 = ssub.s32 %s1790_s29, %s2279_s12 }
  0x59   : > { %p1981_p2 = por %p60_p1, %p59_p11  ;;  %p45_p10 = scmp.ge.s32.totalorder %s2281_s21, 2 }
  0x5a   : > { %p2252_p4 = scmp.eq.s32.totalorder %s1890_s9, 3  ;;  %p1371_p8 = scmp.lt.s32.totalorder %s1798_s8, 4 }
  0x5b   : > { %s289_s19 = sand.u32 1, %s1778_s26   ;;  %s2283_s21 = smov (%p45_p10, %s2281_s21), 0 }
  0x5c   : > { %p1987_p6 = por %p2252_p4, %p59_p11  ;;  %2254 = sst [smem:[#allocation22_spill]] %s2283_s21 }
  0x5d   : > { %s1995_s20 = sshll.u32 %s289_s19, 3  ;;  %s47_s10 = ssub.s32 %s1794_s30, %s2283_s21 }
  0x5e   : > { %s2253_s18 = scalar_select %p1987_p6, 1, 0 }
  0x5f   : > { %s49_s14 = sor.u32 %s48_s22, %s47_s10  ;;  %s1238_s17 = sshll.u32 %s1794_s30, 1 }
  0x60   : > { %p50_p13 = scmp.eq.s32.totalorder %s49_s14, 0  ;;  %s298_s15 = sadd.s32 %s1790_s29, %s1238_s17 }
  0x61   : > { %s1239_s7 = sshll.u32 %s298_s15, 7  ;;  %s293_s24 = scalar_lea.vmem [#allocation2], %s1995_s20 }
  0x62   : > { %s302_s2 = sshll.u32 %s293_s24, 4  ;;  %s2008_s6 = scalar_lea.hbm %s2219_s0, %s1239_s7  ;;  %s2010_s2 = int_to_ptr.vmem [resolvable:$true] %s302_s2 }
  0x63   : > { %s2003_s4 = scalar_select %p50_p13, %s1778_s26, %s52_s16  }
  0x64   : > { %p2016_p0 = pnand %p1371_p8, %p1981_p2  ;;  %s2023_s5 = scalar_lea.hbm %s2220_s1, %s1239_s7 }
  0x65   : > { %s309_s12 = sand.u32 1, %s1798_s8   ;;  %s290_s14 = scalar_lea.sflag [#allocation3], %s289_s19 }
  0x66   : > { %s1596_s17 = scalar_lea.hbm %s2008_s6, 128  ;;  %p1598_p5 = pneg %p2016_p0 }
  0x67   : > { %p1597_p3 = scmp.ne.s32.totalorder %s2008_s6, %s1596_s17  ;;  %s1601_s24 = scalar_lea.hbm %s2219_s0, 512 }
  0x68   : > { %p1602_p12 = scmp.lt.u32.totalorder %s2008_s6, %s2219_s0  ;;  %p1603_p11 = scmp.lt.u32.totalorder %s1601_s24, %s1596_s17 }
  0x69   : > { %p1599_p7 = pnand %p1598_p5, %p1597_p3  ;;  %p1605_p2 = scmp.lt.u32.totalorder %s1596_s17, %s2008_s6 }
  0x6a   : > { %p1604_p1 = por %p1603_p11, %p1602_p12 }
  0x6b   : > { %p1600_p9 = pneg %p1599_p7 }
  0x6c   : > { %p1606_p10 = por %p1605_p2, %p1604_p1 }
  0x6e   : > { %p1607_p4 = pnand %p1606_p10, %p1600_p9 }
  0x70   : > { %1610 = shalt.err (!%p1607_p4)
}
  0x71   : > { %s1611_s19 = scalar_lea.vmem %s2010_s2, 128  ;;  %s1804_s7 = smov [#allocation2]  }
  0x72   : > { %p1612_p8 = scmp.ne.s32.totalorder %s2010_s2, %s1611_s19  ;;  %s1616_s16 = sshll.u32 %s1804_s7, 4  ;;  %s1617_s16 = int_to_ptr.vmem [resolvable:$false] %s1616_s16 }
  0x73   : > { %s1618_s21 = scalar_lea.vmem %s1617_s16, 256  ;;  %p1619_p7 = scmp.lt.s32.totalorder %s2010_s2, %s1617_s16 }
  0x74   : > { %p1614_p13 = pnand %p1612_p8, %p1598_p5  ;;  %p1620_p12 = scmp.lt.s32.totalorder %s1618_s21, %s1611_s19 }
  0x76   : > { %p1615_p3 = pneg %p1614_p13  ;;  %p1621_p11 = por %p1620_p12, %p1619_p7 }
  0x78   : > { %p1622_p1 = pnand %p1621_p11, %p1615_p3 }
  0x7a   : > { %1625 = shalt.err (!%p1622_p1)
}
  0x7b   : > { %1358 = dma.hbm_to_vmem [thread:$0]  (!%p2016_p0), %s2008_s6, 128, %s2010_s2, %s290_s14  }
  0x7c   : > { %s313_s17 = scalar_lea.vmem [#allocation5], %s1995_s20  ;;  %s310_s15 = scalar_lea.sflag [#allocation6], %s309_s12 }
  0x7d   : > { %s322_s23 = sshll.u32 %s313_s17, 4  ;;  %s1626_s24 = scalar_lea.hbm %s2023_s5, 128  ;;  %s323_s23 = int_to_ptr.vmem [resolvable:$true] %s322_s23 }
  0x7e   : > { %p1627_p9 = scmp.ne.s32.totalorder %s2023_s5, %s1626_s24  ;;  %s1631_s7 = scalar_lea.hbm %s2220_s1, 512 }
  0x7f   : > { %p1632_p4 = scmp.lt.u32.totalorder %s2023_s5, %s2220_s1  ;;  %p1633_p8 = scmp.lt.u32.totalorder %s1631_s7, %s1626_s24 }
  0x80   : > { %p1629_p2 = pnand %p1627_p9, %p1598_p5  ;;  %p1635_p3 = scmp.lt.u32.totalorder %s1626_s24, %s2023_s5 }
  0x81   : > { %p1634_p13 = por %p1633_p8, %p1632_p4 }
  0x82   : > { %p1630_p10 = pneg %p1629_p2 }
  0x83   : > { %p1636_p7 = por %p1635_p3, %p1634_p13 }
  0x85   : > { %p1637_p12 = pnand %p1636_p7, %p1630_p10 }
  0x87   : > { %1640 = shalt.err (!%p1637_p12)
}
  0x88   : > { %s1641_s2 = scalar_lea.vmem %s323_s23, 128  ;;  %s1805_s6 = smov [#allocation5]  }
  0x89   : > { %p1642_p11 = scmp.ne.s32.totalorder %s323_s23, %s1641_s2  ;;  %s1646_s20 = sshll.u32 %s1805_s6, 4  ;;  %s1647_s20 = int_to_ptr.vmem [resolvable:$false] %s1646_s20 }
  0x8a   : > { %s1648_s12 = scalar_lea.vmem %s1647_s20, 256  ;;  %p1649_p2 = scmp.lt.s32.totalorder %s323_s23, %s1647_s20 }
  0x8b   : > { %p1644_p1 = pnand %p1642_p11, %p1598_p5  ;;  %p1650_p6 = scmp.lt.s32.totalorder %s1648_s12, %s1641_s2 }
  0x8d   : > { %p1645_p9 = pneg %p1644_p1  ;;  %p1651_p4 = por %p1650_p6, %p1649_p2 }
  0x8f   : > { %p1652_p8 = pnand %p1651_p4, %p1645_p9 }
  0x91   : > { %1655 = shalt.err (!%p1652_p8)
}
  0x92   : > { %1361 = dma.hbm_to_vmem [thread:$0]  (!%p2016_p0), %s2023_s5, 128, %s323_s23, %s310_s15  }
  0x93   : > { %p2256_p10 = scmp.ne.s32.totalorder %s2246_s13, 0 }
  0x94   : > { %s2076_s14 = sand.u32 (!%p2256_p10), 1, %s1774_s25   ;;  %p2257_p6 = scmp.ne.s32.totalorder (!%p2256_p10), %s2243_s11, 0 }
  0x95   : > { %331 = sbr.rel (%p2256_p10) target bundleno = 463 (0x1cf), region = 44  ;;  %s1244_s17 = sshll.u32 (!%p2256_p10), %s2076_s14, 3 }
  0x96   : > { %s334_s24 = scalar_lea.sflag (!%p2256_p10), [#allocation3], %s2076_s14  ;;  %s2080_s10 = scalar_lea.vmem (!%p2256_p10), [#allocation2], %s1244_s17 }
  0x9c   : > { %1745 = dma.done.wait (%p2257_p6), %s334_s24, 128  }
  0x9d   : > { %1747 = vsyncadd (%p2257_p6), %s334_s24, 4294967168  ;;  %s342_s22 = sand.u32 1, %s1890_s9   ;;  %s2087_s5 = scalar_lea.vmem [#allocation5], %s1244_s17 }
  0x9e   : > { %s343_s13 = scalar_lea.sflag [#allocation6], %s342_s22 }
  0x9f   : > { %1749 = dma.done.wait (%p2257_p6), %s343_s13, 128  }
  0xa0   : > { %1751 = vsyncadd (%p2257_p6), %s343_s13, 4294967168  ;;  %p2258_p0 = scmp.eq.s32.totalorder %s1890_s9, 0 }
  0xa2   : > { %1753 = dma.done.wait (%p2258_p0), [#allocation6], 4096   ;;  %p2259_p5 = pmov %p2258_p0 }
  0xa3   : > { %p2260_p13 = pmov %p2258_p0 }
  0xa4   : > { %1755 = vsyncadd (%p2259_p5), [#allocation6], 4294963200 }
  0xa5   : > { %1757 = dma.done.wait (%p2260_p13), [#allocation9], 4096   ;;  %p2261_p3 = pmov %p2258_p0 }
  0xa6   : > { %v1806_v0 = vmov 0   ;;  %v1444_v1 = vld [vmem:[#allocation7 + $0x4] ss:$16 sps:$4 sm:$0xff]   ;;  %v1446_v2 = vld [vmem:[#allocation7 + $0xc] ss:$16 sps:$4 sm:$0xff]   ;;  %s1320_s23 = sshll.u32 %s1782_s27, 2 }
  0xa7   : > { %1759 = vsyncadd (%p2261_p3), [#allocation9], 4294963200  ;;  %646 = vmatprep.mubr.bf16.mxu0 %v1806_v0  ;;  %687 = vmatprep.mubr.bf16.mxu1 %v1806_v0  ;;  %v1448_v3 = vld [vmem:[#allocation7] ss:$16 sps:$4 sm:$0xff]   ;;  %v1449_v4 = vld [vmem:[#allocation7 + $0x8] ss:$16 sps:$4 sm:$0xff]  }
  0xa8   : > { %614 = vmatprep.subr.bf16.mxu0 %v1444_v1  ;;  %655 = vmatprep.subr.bf16.mxu1 %v1446_v2  ;;  %v1450_v5 = vld [vmem:[#allocation7 + $0x24] ss:$16 sps:$4 sm:$0xff]   ;;  %v1452_v6 = vld [vmem:[#allocation7 + $0x2c] ss:$16 sps:$4 sm:$0xff]   ;;  %v1454_v7 = vld [vmem:[#allocation7 + $0x20] ss:$16 sps:$4 sm:$0xff]  }
  0xa9   : > { %615 = vmatpush1.bf16.msra.mxu0 %v1448_v3  ;;  %656 = vmatpush1.bf16.msra.mxu1 %v1449_v4  ;;  %v1455_v8 = vld [vmem:[#allocation7 + $0x28] ss:$16 sps:$4 sm:$0xff]   ;;  %v1456_v9 = vld [vmem:[#allocation7 + $0x44] ss:$16 sps:$4 sm:$0xff]   ;;  %v1458_v10 = vld [vmem:[#allocation7 + $0x4c] ss:$16 sps:$4 sm:$0xff]  }
  0xaa   : > { %616 = vmatprep.subr.bf16.mxu0 %v1450_v5  ;;  %657 = vmatprep.subr.bf16.mxu1 %v1452_v6  ;;  %v1460_v11 = vld [vmem:[#allocation7 + $0x40] ss:$16 sps:$4 sm:$0xff]   ;;  %v1461_v12 = vld [vmem:[#allocation7 + $0x48] ss:$16 sps:$4 sm:$0xff]   ;;  %v1462_v13 = vld [vmem:[#allocation7 + $0x64] ss:$16 sps:$4 sm:$0xff]   ;;  %v434_v5 = vlaneseq }
  0xab   : > { %v1464_v14 = vld [vmem:[#allocation7 + $0x6c] ss:$16 sps:$4 sm:$0xff]   ;;  %v1466_v15 = vld [vmem:[#allocation7 + $0x60] ss:$16 sps:$4 sm:$0xff]   ;;  %v1467_v16 = vld [vmem:[#allocation7 + $0x68] ss:$16 sps:$4 sm:$0xff]  }
  0xac   : > { %v1468_v17 = vld [vmem:[#allocation7 + $0x84] ss:$16 sps:$4 sm:$0xff]   ;;  %v1470_v18 = vld [vmem:[#allocation7 + $0x8c] ss:$16 sps:$4 sm:$0xff]   ;;  %v1472_v19 = vld [vmem:[#allocation7 + $0x80] ss:$16 sps:$4 sm:$0xff]  }
  0xad   : > { %617 = vmatpush1.bf16.msra.mxu0 %v1454_v7  ;;  %658 = vmatpush1.bf16.msra.mxu1 %v1455_v8  ;;  %v1473_v20 = vld [vmem:[#allocation7 + $0x88] ss:$16 sps:$4 sm:$0xff]   ;;  %v1474_v21 = vld [vmem:[#allocation7 + $0xa4] ss:$16 sps:$4 sm:$0xff]   ;;  %v1476_v22 = vld [vmem:[#allocation7 + $0xac] ss:$16 sps:$4 sm:$0xff]  }
  0xae   : > { %618 = vmatprep.subr.bf16.mxu0 %v1456_v9  ;;  %659 = vmatprep.subr.bf16.mxu1 %v1458_v10  ;;  %v1478_v23 = vld [vmem:[#allocation7 + $0xa0] ss:$16 sps:$4 sm:$0xff]   ;;  %v1479_v24 = vld [vmem:[#allocation7 + $0xa8] ss:$16 sps:$4 sm:$0xff]   ;;  %v1480_v25 = vld [vmem:[#allocation7 + $0xc4] ss:$16 sps:$4 sm:$0xff]  }
  0xaf   : > { %v1482_v26 = vld [vmem:[#allocation7 + $0xcc] ss:$16 sps:$4 sm:$0xff]   ;;  %v1484_v27 = vld [vmem:[#allocation7 + $0xc0] ss:$16 sps:$4 sm:$0xff]   ;;  %v1485_v28 = vld [vmem:[#allocation7 + $0xc8] ss:$16 sps:$4 sm:$0xff]  }
  0xb0   : > { %v1486_v29 = vld [vmem:[#allocation7 + $0xe4] ss:$16 sps:$4 sm:$0xff]   ;;  %v1488_v30 = vld [vmem:[#allocation7 + $0xec] ss:$16 sps:$4 sm:$0xff]   ;;  %v1490_v31 = vld [vmem:[#allocation7 + $0xe0] ss:$16 sps:$4 sm:$0xff]  }
  0xb1   : > { %619 = vmatpush1.bf16.msra.mxu0 %v1460_v11  ;;  %660 = vmatpush1.bf16.msra.mxu1 %v1461_v12  ;;  %v1491_v32 = vld [vmem:[#allocation7 + $0xe8] ss:$16 sps:$4 sm:$0xff]   ;;  %v1494_v34 = vld [vmem:[#allocation8 + $0x4] ss:$16 sps:$4 sm:$0xff]   ;;  %v1497_v35 = vld [vmem:[#allocation8 + $0xc] ss:$16 sps:$4 sm:$0xff]  }
  0xb2   : > { %620 = vmatprep.subr.bf16.mxu0 %v1462_v13  ;;  %661 = vmatprep.subr.bf16.mxu1 %v1464_v14  ;;  %v396_v33 = vld [vmem:[%s2080_s10] sm:$0xff]  ;;  %v398_v3 = vld [vmem:[%s2087_s5] sm:$0xff]  ;;  %v2107_v6 = vshrl.u32 %v434_v5, 7  ;;  %s1321_s15 = sshll.u32 %s1786_s28, 3  ;;  %s1248_s19 = sshll.u32 %s2076_s14, 4 }
  0xb3   : > { %v397_v36 = vpack.c.bf16 %v396_v33, %v396_v33  ;;  %v1492_v37 = vld [vmem:[#allocation8] ss:$16 sps:$4 sm:$0xff]   ;;  %v1495_v38 = vld [vmem:[#allocation8 + $0x8] ss:$16 sps:$4 sm:$0xff]   ;;  %v1500_v39 = vld [vmem:[#allocation8 + $0x24] ss:$16 sps:$4 sm:$0xff]   ;;  %v399_v4 = vpack.c.bf16 %v398_v3, %v398_v3  ;;  %s2119_s7 = sadd.s32 %s1321_s15, %s1320_s23 }
  0xb4   : > { %v1503_v40 = vld [vmem:[#allocation8 + $0x2c] ss:$16 sps:$4 sm:$0xff]   ;;  %v1498_v41 = vld [vmem:[#allocation8 + $0x20] ss:$16 sps:$4 sm:$0xff]   ;;  %v1501_v42 = vld [vmem:[#allocation8 + $0x28] ss:$16 sps:$4 sm:$0xff]  }
  0xb5   : > { %621 = vmatpush1.bf16.msra.mxu0 %v1466_v15  ;;  %662 = vmatpush1.bf16.msra.mxu1 %v1467_v16  ;;  %v1506_v43 = vld [vmem:[#allocation8 + $0x44] ss:$16 sps:$4 sm:$0xff]   ;;  %v1509_v44 = vld [vmem:[#allocation8 + $0x4c] ss:$16 sps:$4 sm:$0xff]   ;;  %v1504_v45 = vld [vmem:[#allocation8 + $0x40] ss:$16 sps:$4 sm:$0xff]  }
  0xb6   : > { %622 = vmatprep.subr.bf16.mxu0 %v1468_v17  ;;  %663 = vmatprep.subr.bf16.mxu1 %v1470_v18  ;;  %v1507_v46 = vld [vmem:[#allocation8 + $0x48] ss:$16 sps:$4 sm:$0xff]   ;;  %v1512_v47 = vld [vmem:[#allocation8 + $0x64] ss:$16 sps:$4 sm:$0xff]   ;;  %v1515_v48 = vld [vmem:[#allocation8 + $0x6c] ss:$16 sps:$4 sm:$0xff]  }
  0xb7   : > { %v1510_v49 = vld [vmem:[#allocation8 + $0x60] ss:$16 sps:$4 sm:$0xff]   ;;  %v1513_v50 = vld [vmem:[#allocation8 + $0x68] ss:$16 sps:$4 sm:$0xff]   ;;  %v1518_v51 = vld [vmem:[#allocation8 + $0x84] ss:$16 sps:$4 sm:$0xff]  }
  0xb8   : > { %v1521_v52 = vld [vmem:[#allocation8 + $0x8c] ss:$16 sps:$4 sm:$0xff]   ;;  %v1516_v53 = vld [vmem:[#allocation8 + $0x80] ss:$16 sps:$4 sm:$0xff]   ;;  %v1519_v54 = vld [vmem:[#allocation8 + $0x88] ss:$16 sps:$4 sm:$0xff]  }
  0xb9   : > { %623 = vmatpush1.bf16.msra.mxu0 %v1472_v19  ;;  %664 = vmatpush1.bf16.msra.mxu1 %v1473_v20  ;;  %v1524_v55 = vld [vmem:[#allocation8 + $0xa4] ss:$16 sps:$4 sm:$0xff]   ;;  %v1527_v56 = vld [vmem:[#allocation8 + $0xac] ss:$16 sps:$4 sm:$0xff]   ;;  %v1522_v57 = vld [vmem:[#allocation8 + $0xa0] ss:$16 sps:$4 sm:$0xff]  }
  0xba   : > { %624 = vmatprep.subr.bf16.mxu0 %v1474_v21  ;;  %665 = vmatprep.subr.bf16.mxu1 %v1476_v22  ;;  %v1525_v58 = vld [vmem:[#allocation8 + $0xa8] ss:$16 sps:$4 sm:$0xff]   ;;  %v1530_v59 = vld [vmem:[#allocation8 + $0xc4] ss:$16 sps:$4 sm:$0xff]   ;;  %v1533_v60 = vld [vmem:[#allocation8 + $0xcc] ss:$16 sps:$4 sm:$0xff]  }
  0xbb   : > { %v1528_v61 = vld [vmem:[#allocation8 + $0xc0] ss:$16 sps:$4 sm:$0xff]   ;;  %v1531_v62 = vld [vmem:[#allocation8 + $0xc8] ss:$16 sps:$4 sm:$0xff]   ;;  %v1536_v63 = vld [vmem:[#allocation8 + $0xe4] ss:$16 sps:$4 sm:$0xff]  }
  0xbc   : > { %v1534_v1 = vld [vmem:[#allocation8 + $0xe0] ss:$16 sps:$4 sm:$0xff]   ;;  %v1537_v2 = vld [vmem:[#allocation8 + $0xe8] ss:$16 sps:$4 sm:$0xff]   ;;  %v436_v7 = vsub.s32 0, %v2107_v6  ;;  %v444_v8 = vsub.s32 2, %v2107_v6 }
  0xbd   : > { %625 = vmatpush1.bf16.msra.mxu0 %v1478_v23  ;;  %666 = vmatpush1.bf16.msra.mxu1 %v1479_v24  ;;  %v432_v9 = vld [vmem:[%s2222_s3] sm:$0xf]  ;;  %v440_v10 = vsub.s32 1, %v2107_v6  ;;  %v448_v11 = vsub.s32 3, %v2107_v6  ;;  %s1322_s16 = sshll.u32 %s2119_s7, 6  ;;  %s387_s27 = scalar_lea.vmem [#allocation10], %s1248_s19 }
  0xbe   : > { %626 = vmatprep.subr.bf16.mxu0 %v1480_v25  ;;  %667 = vmatprep.subr.bf16.mxu1 %v1482_v26  ;;  %v437_v12 = vrot.slane %v432_v9, %v436_v7  ;;  %v445_v13 = vrot.slane %v432_v9, %v444_v8  ;;  %s1050_s28 = sshll.u32 %s387_s27, 4  ;;  %s2262_s6 = sld [smem:[#allocation26_spill]]  ;;  %s2131_s28 = int_to_ptr.vmem [resolvable:$true] %s1050_s28 }
  0xbf   : > { %v441_v14 = vrot.slane %v432_v9, %v440_v10  ;;  %v449_v15 = vrot.slane %v432_v9, %v448_v11  ;;  %s1029_s12 = scalar_lea.sflag [#allocation4], %s2076_s14  ;;  %s1656_s17 = scalar_lea.vmem %s2131_s28, 256 }
  0xc0   : > { %p1657_p7 = scmp.ne.s32.totalorder %s2131_s28, %s1656_s17  ;;  %p2263_p12 = scmp.ne.s32.totalorder %s2253_s18, 0 }
  0xc1   : > { %627 = vmatpush1.bf16.msra.mxu0 %v1484_v27  ;;  %668 = vmatpush1.bf16.msra.mxu1 %v1485_v28  ;;  %s1807_s24 = smov [#allocation10]  }
  0xc2   : > { %628 = vmatprep.subr.bf16.mxu0 %v1486_v29  ;;  %669 = vmatprep.subr.bf16.mxu1 %v1488_v30  ;;  %p1658_p11 = pnand %p1657_p7, %p2263_p12  ;;  %s1660_s10 = sshll.u32 %s1807_s24, 4  ;;  %s1661_s10 = int_to_ptr.vmem [resolvable:$false] %s1660_s10 }
  0xc3   : > { %s1662_s22 = scalar_lea.vmem %s1661_s10, 512  ;;  %p1663_p9 = scmp.lt.s32.totalorder %s2131_s28, %s1661_s10 }
  0xc4   : > { %s2129_s20 = scalar_lea.hbm %s2262_s6, %s1322_s16  ;;  %p1659_p1 = pneg %p1658_p11 }
  0xc5   : > { %629 = vmatpush1.bf16.msra.mxu0 %v1490_v31  ;;  %670 = vmatpush1.bf16.msra.mxu1 %v1491_v32  ;;  %p1664_p2 = scmp.lt.s32.totalorder %s1662_s22, %s1656_s17 }
  0xc6   : > { %910 = vmatprep.subr.bf16.mxu0 %v1494_v34  ;;  %951 = vmatprep.subr.bf16.mxu1 %v1497_v35 }
  0xc7   : > { %p1665_p4 = por %p1664_p2, %p1663_p9 }
  0xc8   : > { %647 = vmatmul.mubr.bf16.vlgmr.msra.gmra.mrb[0].mxu0 %v397_v36  ;;  %688 = vmatmul.mubr.bf16.vlgmr.msra.gmra.mrb[0].mxu1 %v397_v36 }
  0xc9   : > { %911 = vmatpush1.bf16.msra.mxu0 %v1492_v37  ;;  %952 = vmatpush1.bf16.msra.mxu1 %v1495_v38  ;;  %p1666_p8 = pnand %p1665_p4, %p1659_p1 }
  0xca   : > { %912 = vmatprep.subr.bf16.mxu0 %v1500_v39  ;;  %953 = vmatprep.subr.bf16.mxu1 %v1503_v40 }
  0xcb   : > { %942 = vmatprep.mubr.bf16.mxu0 %v1806_v0  ;;  %983 = vmatprep.mubr.bf16.mxu1 %v1806_v0  ;;  %v1539_v0 = vld [vmem:[#allocation8 + $0xec] ss:$16 sps:$4 sm:$0xff]  }
  0xcd   : > { %913 = vmatpush1.bf16.msra.mxu0 %v1498_v41  ;;  %954 = vmatpush1.bf16.msra.mxu1 %v1501_v42 }
  0xce   : > { %914 = vmatprep.subr.bf16.mxu0 %v1506_v43  ;;  %955 = vmatprep.subr.bf16.mxu1 %v1509_v44 }
  0xd1   : > { %915 = vmatpush1.bf16.msra.mxu0 %v1504_v45  ;;  %956 = vmatpush1.bf16.msra.mxu1 %v1507_v46 }
  0xd2   : > { %916 = vmatprep.subr.bf16.mxu0 %v1512_v47  ;;  %957 = vmatprep.subr.bf16.mxu1 %v1515_v48 }
  0xd5   : > { %917 = vmatpush1.bf16.msra.mxu0 %v1510_v49  ;;  %958 = vmatpush1.bf16.msra.mxu1 %v1513_v50 }
  0xd6   : > { %918 = vmatprep.subr.bf16.mxu0 %v1518_v51  ;;  %959 = vmatprep.subr.bf16.mxu1 %v1521_v52 }
  0xd9   : > { %919 = vmatpush1.bf16.msra.mxu0 %v1516_v53  ;;  %960 = vmatpush1.bf16.msra.mxu1 %v1519_v54 }
  0xda   : > { %920 = vmatprep.subr.bf16.mxu0 %v1524_v55  ;;  %961 = vmatprep.subr.bf16.mxu1 %v1527_v56 }
  0xdd   : > { %921 = vmatpush1.bf16.msra.mxu0 %v1522_v57  ;;  %962 = vmatpush1.bf16.msra.mxu1 %v1525_v58 }
  0xde   : > { %922 = vmatprep.subr.bf16.mxu0 %v1530_v59  ;;  %963 = vmatprep.subr.bf16.mxu1 %v1533_v60 }
  0xe1   : > { %923 = vmatpush1.bf16.msra.mxu0 %v1528_v61  ;;  %964 = vmatpush1.bf16.msra.mxu1 %v1531_v62 }
  0xe2   : > { %924 = vmatprep.subr.bf16.mxu0 %v1536_v63  ;;  %965 = vmatprep.subr.bf16.mxu1 %v1539_v0 }
  0xe5   : > { %925 = vmatpush1.bf16.msra.mxu0 %v1534_v1  ;;  %966 = vmatpush1.bf16.msra.mxu1 %v1537_v2 }
  0xe8   : > { %943 = vmatmul.mubr.bf16.vlgmr.msra.gmra.mrb[4].mxu0 %v399_v4  ;;  %984 = vmatmul.mubr.bf16.vlgmr.msra.gmra.mrb[4].mxu1 %v399_v4 }
 0x19b   : > { %v648_v16 = vpop.f32.mrb[0].mxu0  ;;  %v689_v17 = vpop.f32.mrb[0].mxu1 }
 0x19c   : > { %v649_v18 = vadd.f32 %v648_v16, %v437_v12  ;;  %v690_v19 = vadd.f32 %v689_v17, %v445_v13  ;;  %v650_v20 = vpop.f32.mrb[1].mxu0  ;;  %v691_v21 = vpop.f32.mrb[1].mxu1 }
 0x19d   : > { %v651_v22 = vadd.f32 %v650_v20, %v441_v14  ;;  %v692_v23 = vadd.f32 %v691_v21, %v449_v15  ;;  %v652_v24 = vpop.f32.mrb[2].mxu0  ;;  %v693_v25 = vpop.f32.mrb[2].mxu1 }
 0x19e   : > { %v653_v26 = vpop.f32.mrb[3].mxu0  ;;  %v694_v27 = vpop.f32.mrb[3].mxu1 }
 0x19f   : > { %v1328_v28 = vpack.c.bf16 %v651_v22, %v649_v18  ;;  %v1329_v29 = vpack.c.bf16 %v692_v23, %v690_v19 }
 0x1a1   : > { %1008 = vst [vmem:[%s387_s27] sm:$0xff] %v1328_v28  ;;  %1009 = vst [vmem:[%s387_s27 + $0x8] sm:$0xff] %v1329_v29 }
 0x1a2   : > { %1669 = shalt.err (!%p1666_p8)
}
 0x1a3   : > { %s1670_s13 = scalar_lea.hbm %s2129_s20, 256  ;;  %s1674_s11 = scalar_lea.hbm %s2262_s6, 1024 }
 0x1a4   : > { %p1671_p10 = scmp.ne.s32.totalorder %s2129_s20, %s1670_s13  ;;  %p1675_p5 = scmp.lt.u32.totalorder %s2129_s20, %s2262_s6 }
 0x1a5   : > { %p1676_p13 = scmp.lt.u32.totalorder %s1674_s11, %s1670_s13  ;;  %p1678_p7 = scmp.lt.u32.totalorder %s1670_s13, %s2129_s20 }
 0x1a6   : > { %p1672_p6 = pnand %p1671_p10, %p2263_p12 }
 0x1a7   : > { %p1677_p3 = por %p1676_p13, %p1675_p5 }
 0x1a8   : > { %p1673_p0 = pneg %p1672_p6 }
 0x1a9   : > { %p1679_p11 = por %p1678_p7, %p1677_p3 }
 0x1ab   : > { %p1680_p1 = pnand %p1679_p11, %p1673_p0 }
 0x1ad   : > { %1683 = shalt.err (!%p1680_p1)
}
 0x1ae   : > { %1344 = dma.vmem_to_hbm [thread:$0]  (%p2263_p12), %s2131_s28, 256, %s2129_s20, %s1029_s12  }
 0x1af   : > { %s2264_s2 = sld [smem:[#allocation25_spill]]  ;;  %s394_s17 = scalar_lea.vmem [#allocation11], %s1248_s19 }
 0x1b0   : > { %s1066_s24 = sshll.u32 %s394_s17, 4  ;;  %s2265_s12 = sld [smem:[#allocation27_spill]]  ;;  %s2167_s24 = int_to_ptr.vmem [resolvable:$true] %s1066_s24 }
 0x1b1   : > { %s1034_s19 = scalar_lea.sflag [#allocation12], %s2076_s14  ;;  %s1684_s22 = scalar_lea.vmem %s2167_s24, 256 }
 0x1b2   : > { %p1685_p9 = scmp.ne.s32.totalorder %s2167_s24, %s1684_s22  ;;  %s1808_s13 = smov [#allocation11]  }
 0x1b3   : > { %s1688_s7 = sshll.u32 %s1808_s13, 4  ;;  %s1689_s7 = int_to_ptr.vmem [resolvable:$false] %s1688_s7 }
 0x1b4   : > { %p1686_p2 = pnand %p1685_p9, %p2263_p12  ;;  %s1690_s5 = scalar_lea.vmem %s1689_s7, 512 }
 0x1b5   : > { %v728_v30 = vld [vmem:[%s2264_s2] sm:$0xf]  ;;  %p1691_p8 = scmp.lt.s32.totalorder %s2167_s24, %s1689_s7  ;;  %p1692_p10 = scmp.lt.s32.totalorder %s1690_s5, %s1684_s22 }
 0x1b6   : > { %v733_v31 = vrot.slane %v728_v30, %v436_v7  ;;  %v741_v32 = vrot.slane %v728_v30, %v444_v8  ;;  %v737_v33 = vrot.slane %v728_v30, %v440_v10  ;;  %v745_v34 = vrot.slane %v728_v30, %v448_v11  ;;  %s2165_s10 = scalar_lea.hbm %s2265_s12, %s1322_s16  ;;  %p1687_p4 = pneg %p1686_p2 }
 0x1b7   : > { %p1693_p6 = por %p1692_p10, %p1691_p8 }
 0x1b9   : > { %p1694_p0 = pnand %p1693_p6, %p1687_p4 }
 0x1bb   : > { %v944_v35 = vpop.f32.mrb[4].mxu0  ;;  %v985_v36 = vpop.f32.mrb[4].mxu1 }
 0x1bc   : > { %v945_v37 = vadd.f32 %v944_v35, %v733_v31  ;;  %v986_v38 = vadd.f32 %v985_v36, %v741_v32  ;;  %v946_v39 = vpop.f32.mrb[5].mxu0  ;;  %v987_v40 = vpop.f32.mrb[5].mxu1 }
 0x1bd   : > { %v947_v41 = vadd.f32 %v946_v39, %v737_v33  ;;  %v988_v42 = vadd.f32 %v987_v40, %v745_v34  ;;  %v948_v43 = vpop.f32.mrb[6].mxu0  ;;  %v989_v44 = vpop.f32.mrb[6].mxu1 }
 0x1be   : > { %v949_v45 = vpop.f32.mrb[7].mxu0  ;;  %v990_v46 = vpop.f32.mrb[7].mxu1 }
 0x1bf   : > { %v1330_v47 = vpack.c.bf16 %v947_v41, %v945_v37  ;;  %v1331_v48 = vpack.c.bf16 %v988_v42, %v986_v38 }
 0x1c1   : > { %1026 = vst [vmem:[%s394_s17] sm:$0xff] %v1330_v47  ;;  %1027 = vst [vmem:[%s394_s17 + $0x8] sm:$0xff] %v1331_v48 }
 0x1c2   : > { %1697 = shalt.err (!%p1694_p0)
}
 0x1c3   : > { %s1698_s14 = scalar_lea.hbm %s2165_s10, 256  ;;  %s1702_s11 = scalar_lea.hbm %s2265_s12, 1024 }
 0x1c4   : > { %p1699_p5 = scmp.ne.s32.totalorder %s2165_s10, %s1698_s14  ;;  %p1703_p7 = scmp.lt.u32.totalorder %s2165_s10, %s2265_s12 }
 0x1c5   : > { %p1704_p11 = scmp.lt.u32.totalorder %s1702_s11, %s1698_s14  ;;  %p1706_p9 = scmp.lt.u32.totalorder %s1698_s14, %s2165_s10 }
 0x1c6   : > { %p1700_p13 = pnand %p1699_p5, %p2263_p12 }
 0x1c7   : > { %p1705_p1 = por %p1704_p11, %p1703_p7 }
 0x1c8   : > { %p1701_p3 = pneg %p1700_p13 }
 0x1c9   : > { %p1707_p2 = por %p1706_p9, %p1705_p1 }
 0x1cb   : > { %p1708_p4 = pnand %p1707_p2, %p1701_p3 }
 0x1cd   : > { %1711 = shalt.err (!%p1708_p4)
}
 0x1ce   : > { %1345 = dma.vmem_to_hbm [thread:$0]  (%p2263_p12), %s2167_s24, 256, %s2165_s10, %s1034_s19  }
 0x1cf PF: > { %s2266_s27 = sld [smem:[#allocation19_spill]]  ;;  %s2267_s21 = sld [smem:[#allocation20_spill]] }
 0x1d0   : > { %p1374_p8 = scmp.ge.s32.totalorder %s1798_s8, 2 }
 0x1d5   : > { %s1078_s2 = sand.u32 1, %s2266_s27   ;;  %p2268_p10 = scmp.ne.s32.totalorder %s2267_s21, 0 }
 0x1d6   : > { %s1079_s17 = scalar_lea.sflag [#allocation4], %s1078_s2 }
 0x1d7   : > { %p1363_p6 = pnand %p1374_p8, %p2268_p10 }
 0x1d9   : > { %1761 = dma.done.wait (!%p1363_p6), %s1079_s17, 256  }
 0x1da   : > { %1763 = vsyncadd (!%p1363_p6), %s1079_s17, 4294967040  ;;  %s1088_s28 = scalar_lea.sflag [#allocation12], %s1078_s2 }
 0x1db   : > { %1765 = dma.done.wait (!%p1363_p6), %s1088_s28, 256  }
 0x1dc   : > { %1767 = vsyncadd (!%p1363_p6), %s1088_s28, 4294967040  ;;  %s31_s8 = sadd.s32 1, %s1798_s8   ;;  %s2269_s18 = sld [smem:[#allocation21_spill]] }
 0x1dd   : > { %p28_p0 = scmp.ge.s32.totalorder %s31_s8, 6   ;;  %s2270_s20 = sld [smem:[#allocation22_spill]] }
 0x1de   : > { %s2271_s24 = smov %s1774_s25  ;;  %s2272_s25 = smov %s1778_s26 }
 0x1df   : > { %s2273_s26 = smov %s2003_s4  ;;  %s2274_s27 = smov %s1790_s29 }
 0x1e0   : > { %s2275_s28 = smov %s1794_s30  ;;  %30 = sbr.rel (!%p28_p0) target bundleno = 18 (0x12), region = 127 }
 0x1e2   : > { %s2276_s29 = smov %s2269_s18 }
 0x1e3   : > { %s2277_s30 = smov %s2270_s20 }
 0x1e7   :  { %1093 = vsyncpa [#allocation3], 1 }
 0x1e8   :  { %1095 = vsyncpa [#allocation3 + $0x1], 1 }
 0x1e9   :  { %1096 = vsyncpa [#allocation6], 1 }
 0x1ea   :  { %1098 = vsyncpa [#allocation6 + $0x1], 1 }
 0x1eb   :  { %1099 = vsyncpa [#allocation9], 1 }
 0x1ec   :  { %1100 = vsyncpa [#allocation4], 1 }
 0x1ed   :  { %1102 = vsyncpa [#allocation4 + $0x1], 1 }
 0x1ee   :  { %1103 = vsyncpa [#allocation12], 1 }
 0x1ef   :  { %1105 = vsyncpa [#allocation12 + $0x1], 1 }

</bundles_post_ra>
